<compile_context>
chip_gen: v6e
topology: v6e:2x2x1
jax: 0.10.0
libtpu: 0.0.40
codegen_flags: <defaults>
</compile_context>

<pallas_src>
import functools

import jax
import jax.numpy as jnp
from jax.experimental import pallas as pl
from jax.experimental.pallas import tpu as pltpu


CLASS_SIZE = 18       # 'basketball'
FEAT_DIM = 768        # nn.Linear(768, class_size)


def _pick_b_tile(B: int) -> int:
    if B <= 8:
        return B
    if B % 8 == 0:
        return 8
    return B  # fallback: full-B block (leading dim has no tiling constraint)


def _pick_s_tile(S: int) -> int:
    if S <= 512:
        return S
    # largest multiple of 8 (sublane) <= 512 that divides S
    for st in range(512, 7, -8):
        if S % st == 0:
            return st
    return 512  # fall back: pad S up to a multiple of 512 in the wrapper


def _ext_arch2_kernel(x_ref, w_ref, b_ref, o_ref, acc_ref, *, inv_s):
    """Fused pre_logits (mean over T,H,W) + fc, streamed over S tiles.

    x_ref  : [Bt, St, C]   channels-last feature tile (f32 or bf16)
    w_ref  : [C, K]        fc weight (transposed), f32, VMEM-resident
    b_ref  : [1, K]        fc bias, f32
    o_ref  : [Bt, K]       logits
    acc_ref: [Bt, C]       f32 partial-sum accumulator (VMEM scratch)
    """
    s_step = pl.program_id(1)

    @pl.when(s_step == 0)
    def _init():
        acc_ref[...] = jnp.zeros_like(acc_ref)

    # Partial pooled sum over this S tile. Channels-last layout keeps the
    # lane axis (C = 768 = 6*128) fully dense; the reduce runs over sublanes.
    acc_ref[...] += jnp.sum(x_ref[...].astype(jnp.float32), axis=1)

    @pl.when(s_step == pl.num_programs(1) - 1)
    def _finalize():
        pooled = acc_ref[...] * inv_s                         # mean over (T,H,W)
        logits = jnp.dot(pooled, w_ref[...],
                         preferred_element_type=jnp.float32)  # [Bt, K] on MXU
        o_ref[...] = (logits + b_ref[...]).astype(o_ref.dtype)


def ext_arch2_forward_channels_last(x_bsc, w_ck, bias, *, true_s=None):
    """Core kernel path.  x_bsc: [B, S, 768]; w_ck: [768, K]; bias: [K]."""
    B, S, C = x_bsc.shape
    assert C == FEAT_DIM
    K = CLASS_SIZE
    if true_s is None:
        true_s = S

    Bt = _pick_b_tile(B)
    St = _pick_s_tile(S)
    S_pad = pl.cdiv(S, St) * St
    if S_pad != S:
        # zero padding does not change the sum; mean divides by true_s below
        x_bsc = jnp.pad(x_bsc, ((0, 0), (0, S_pad - S), (0, 0)))

    w_ck = w_ck.astype(jnp.float32)
    b2 = bias.astype(jnp.float32).reshape(1, K)

    x_block_bytes = Bt * St * C * x_bsc.dtype.itemsize
    fixed_bytes = C * K * 4 + K * 4 + Bt * K * 4 + Bt * C * 4
    vmem_limit = int(max(2 * x_block_bytes + 2 * fixed_bytes + (4 << 20),
                         32 << 20))

    kernel = functools.partial(_ext_arch2_kernel, inv_s=float(1.0 / true_s))

    return pl.pallas_call(
        kernel,
        out_shape=jax.ShapeDtypeStruct((B, K), jnp.float32),
        grid_spec=pltpu.PrefetchScalarGridSpec(
            num_scalar_prefetch=0,
            grid=(B // Bt, S_pad // St),          # reduction axis (S) last
            in_specs=[
                pl.BlockSpec((Bt, St, C), lambda bi, si: (bi, si, 0)),
                pl.BlockSpec((C, K), lambda bi, si: (0, 0)),   # VMEM-resident
                pl.BlockSpec((1, K), lambda bi, si: (0, 0)),
            ],
            out_specs=pl.BlockSpec((Bt, K), lambda bi, si: (bi, 0)),
            scratch_shapes=[pltpu.VMEM((Bt, C), jnp.float32)],
        ),
        compiler_params=pltpu.CompilerParams(
            dimension_semantics=("parallel", "arbitrary"),
            vmem_limit_bytes=vmem_limit,
        ),
        cost_estimate=pl.CostEstimate(
            flops=B * S * C + 2 * B * C * K,
            transcendentals=0,
            bytes_accessed=(B * S * C * x_bsc.dtype.itemsize
                            + C * K * 4 + K * 4 + B * K * 4),
        ),
    )(x_bsc, w_ck, b2)


def ext_arch2_forward(x_ncthw, fc_weight, fc_bias, *, stream_dtype=None):
    """PyTorch-semantics entry point.

    x_ncthw   : [B, 768, T, H, W]   backbone patch_token feature (NCTHW)
    fc_weight : [18, 768]           nn.Linear weight (PyTorch layout)
    fc_bias   : [18]
    returns   : [B, 18] logits (f32)
    """
    B, C, T, H, W = x_ncthw.shape
    assert C == FEAT_DIM
    S = T * H * W
    # TODO(synk): fold this transpose into the backbone's last op in production
    # (have it emit channels-last) to avoid an extra full HBM pass here.
    x_bsc = jnp.transpose(x_ncthw.reshape(B, C, S), (0, 2, 1))
    if stream_dtype is not None:
        x_bsc = x_bsc.astype(stream_dtype)     # e.g. bf16: halve HBM traffic
    return ext_arch2_forward_channels_last(x_bsc, fc_weight.T, fc_bias,
                                           true_s=S)


if __name__ == "__main__":
    key = jax.random.PRNGKey(0)
    kx, kw, kb = jax.random.split(key, 3)

    # Small shapes consistent with the module: feature dim must be 768.
    B, C, T, H, W = 2, FEAT_DIM, 2, 4, 4
    x = jax.random.normal(kx, (B, C, T, H, W), dtype=jnp.float32)

    # fc params in PyTorch layout: weight [18, 768], bias [18].
    w_kc = jax.random.normal(kw, (CLASS_SIZE, FEAT_DIM), dtype=jnp.float32) * 0.02
    bias = jax.random.normal(kb, (CLASS_SIZE,), dtype=jnp.float32) * 0.02

    # f32 path (tight check)
    out = jax.block_until_ready(ext_arch2_forward(x, w_kc, bias))
    ref = x.mean(axis=(2, 3, 4)) @ w_kc.T + bias
    assert out.shape == (B, CLASS_SIZE)
    assert jnp.allclose(out, ref, atol=1e-4, rtol=1e-4), "f32 mismatch vs reference"

    # bf16 streaming path (bandwidth-bound op: half the HBM bytes), f32 accumulation.
    out_bf16 = jax.block_until_ready(
        ext_arch2_forward(x, w_kc, bias, stream_dtype=jnp.bfloat16))
    ref_bf16 = (x.astype(jnp.bfloat16).astype(jnp.float32).mean(axis=(2, 3, 4))
                @ w_kc.T + bias)
    assert jnp.allclose(out_bf16, ref_bf16, atol=1e-2, rtol=1e-2), \
        "bf16-streaming mismatch vs reference"

    print("KERNEL_OK")
</pallas_src>

<mosaic_0001>
module attributes {stable_mosaic.version = 11 : i64} {
  func.func @_ext_arch2_kernel(%arg0: i32, %arg1: i32, %arg2: memref<2x32x768xf32, #tpu.memory_space<vmem>>, %arg3: memref<768x18xf32, #tpu.memory_space<vmem>>, %arg4: memref<1x18xf32, #tpu.memory_space<vmem>>, %arg5: memref<2x18xf32, #tpu.memory_space<vmem>>, %arg6: memref<2x768xf32, #tpu.memory_space<vmem>>) attributes {dimension_semantics = [#tpu.dimension_semantics<parallel>, #tpu.dimension_semantics<arbitrary>], iteration_bounds = array<i64: 1, 1>, scalar_prefetch = 0 : i64, scratch_operands = 1 : i64, tpu.core_type = #tpu.core_type<tc>, window_params = [{transform_indices = @transform_0, window_bounds = array<i64: 2, 32, 768>}, {pipeline_mode = #tpu.pipeline_mode<synchronous>, transform_indices = @transform_1, window_bounds = array<i64: 768, 18>}, {pipeline_mode = #tpu.pipeline_mode<synchronous>, transform_indices = @transform_2, window_bounds = array<i64: 1, 18>}, {transform_indices = @transform_3, window_bounds = array<i64: 2, 18>}]} {
    %c0_i32 = arith.constant 0 : i32
    %0 = arith.cmpi eq, %arg1, %c0_i32 : i32
    %1 = arith.extui %0 : i1 to i32
    %c0_i32_0 = arith.constant 0 : i32
    %2 = arith.cmpi ne, %1, %c0_i32_0 : i32
    scf.if %2 {
      %cst_9 = arith.constant 0.000000e+00 : f32
      %11 = vector.broadcast %cst_9 : f32 to vector<2x768xf32>
      %c0_10 = arith.constant 0 : index
      %c0_11 = arith.constant 0 : index
      %12 = vector.load %arg6[%c0_10, %c0_11] : memref<2x768xf32, #tpu.memory_space<vmem>>, vector<2x768xf32>
      tpu.vector_store %arg6[%c0_10, %c0_11], %11 {strides = array<i32>} : memref<2x768xf32, #tpu.memory_space<vmem>>, vector<2x768xf32>,
    } else {
    }
    %c0 = arith.constant 0 : index
    %c0_1 = arith.constant 0 : index
    %3 = vector.load %arg6[%c0, %c0_1] : memref<2x768xf32, #tpu.memory_space<vmem>>, vector<2x768xf32>
    %c0_2 = arith.constant 0 : index
    %c0_3 = arith.constant 0 : index
    %c0_4 = arith.constant 0 : index
    %4 = vector.load %arg2[%c0_2, %c0_3, %c0_4] : memref<2x32x768xf32, #tpu.memory_space<vmem>>, vector<2x32x768xf32>
    %cst = arith.constant dense<0.000000e+00> : vector<2x768xf32>
    %5 = vector.multi_reduction <add>, %4, %cst [1] : vector<2x32x768xf32> to vector<2x768xf32>
    %6 = arith.addf %3, %5 : vector<2x768xf32>
    %c0_5 = arith.constant 0 : index
    %c0_6 = arith.constant 0 : index
    %7 = vector.load %arg6[%c0_5, %c0_6] : memref<2x768xf32, #tpu.memory_space<vmem>>, vector<2x768xf32>
    tpu.vector_store %arg6[%c0_5, %c0_6], %6 {strides = array<i32>} : memref<2x768xf32, #tpu.memory_space<vmem>>, vector<2x768xf32>,
    %c0_i32_7 = arith.constant 0 : i32
    %8 = arith.cmpi eq, %arg1, %c0_i32_7 : i32
    %9 = arith.extui %8 : i1 to i32
    %c0_i32_8 = arith.constant 0 : i32
    %10 = arith.cmpi ne, %9, %c0_i32_8 : i32
    scf.if %10 {
      %c0_9 = arith.constant 0 : index
      %c0_10 = arith.constant 0 : index
      %11 = vector.load %arg6[%c0_9, %c0_10] : memref<2x768xf32, #tpu.memory_space<vmem>>, vector<2x768xf32>
      %cst_11 = arith.constant 3.125000e-02 : f32
      %12 = vector.broadcast %cst_11 : f32 to vector<2x768xf32>
      %13 = arith.mulf %11, %12 : vector<2x768xf32>
      %c0_12 = arith.constant 0 : index
      %c0_13 = arith.constant 0 : index
      %14 = vector.load %arg3[%c0_12, %c0_13] : memref<768x18xf32, #tpu.memory_space<vmem>>, vector<768x18xf32>
      %cst_14 = arith.constant dense<0.000000e+00> : vector<2x18xf32>
      %15 = tpu.matmul %13, %14, %cst_14 {dimension_numbers = #tpu.dot_dimension_numbers<[1], [0], [0], [1], [0, 0, 1, 1], [], []>} : vector<2x768xf32>, vector<768x18xf32>, vector<2x18xf32> -> vector<2x18xf32>
      %c0_15 = arith.constant 0 : index
      %c0_16 = arith.constant 0 : index
      %16 = vector.load %arg4[%c0_15, %c0_16] : memref<1x18xf32, #tpu.memory_space<vmem>>, vector<1x18xf32>
      %17 = vector.broadcast %16 : vector<1x18xf32> to vector<2x18xf32>
      %18 = arith.addf %15, %17 : vector<2x18xf32>
      %c0_17 = arith.constant 0 : index
      %c0_18 = arith.constant 0 : index
      %19 = vector.load %arg5[%c0_17, %c0_18] : memref<2x18xf32, #tpu.memory_space<vmem>>, vector<2x18xf32>
      tpu.vector_store %arg5[%c0_17, %c0_18], %18 {strides = array<i32>} : memref<2x18xf32, #tpu.memory_space<vmem>>, vector<2x18xf32>,
    } else {
    }
    return
  }
  func.func @transform_0(%arg0: i32, %arg1: i32) -> (i32, i32, i32) {
    %c0_i32 = arith.constant 0 : i32
    %c0_i32_0 = arith.constant 0 : i32
    return %arg0, %arg1, %c0_i32 : i32, i32, i32
  }
  func.func @transform_1(%arg0: i32, %arg1: i32) -> (i32, i32) {
    %c0_i32 = arith.constant 0 : i32
    %c0_i32_0 = arith.constant 0 : i32
    %c0_i32_1 = arith.constant 0 : i32
    return %c0_i32, %c0_i32_0 : i32, i32
  }
  func.func @transform_2(%arg0: i32, %arg1: i32) -> (i32, i32) {
    %c0_i32 = arith.constant 0 : i32
    %c0_i32_0 = arith.constant 0 : i32
    %c0_i32_1 = arith.constant 0 : i32
    return %c0_i32, %c0_i32_0 : i32, i32
  }
  func.func @transform_3(%arg0: i32, %arg1: i32) -> (i32, i32) {
    %c0_i32 = arith.constant 0 : i32
    %c0_i32_0 = arith.constant 0 : i32
    return %arg0, %c0_i32 : i32, i32
  }
}

</mosaic_0001>

<bundles_post_ra>
// kernel: tpu_custom_call.1
= control target key start
LH: loop header
LB: loop body
LE: loop exit
PB: predicated region body
PF: predicated region fallthrough
CT: control target
= control target key end

     0   :  { %v767_v5 = vmov 0.0   ;;  %s1253_s0 = inlined_call_operand.vmem [shape: f32[2,32,768], index: 0, kind: input, shape index: {}]   ;;  %s1254_s1 = inlined_call_operand.vmem [shape: f32[768,18], index: 1, kind: input, shape index: {}]   ;;  %s1255_s2 = inlined_call_operand.vmem [shape: f32[1,18], index: 2, kind: input, shape index: {}]   ;;  %s1256_s3 = inlined_call_operand.hbm [shape: f32[2,18], index: 3, kind: output, shape index: {}]  }
   0x1   :  { %v305_v0 = vld [vmem:[%s1254_s1 + $0xf8] sm:$0xff]  ;;  %v304_v2 = vld [vmem:[%s1254_s1 + $0xf0] sm:$0xff]  ;;  %20 = vst [vmem:[#allocation2 + $0x8] sm:$0xf] %v767_v5  ;;  %v303_v6 = vld [vmem:[%s1254_s1 + $0xe8] sm:$0xff] }
   0x2   :  { %v289_v1 = vld [vmem:[%s1254_s1 + $0x78] sm:$0xff]  ;;  %637 = vmatprep.subr.mxu0 %v305_v0  ;;  %v288_v3 = vld [vmem:[%s1254_s1 + $0x70] sm:$0xff]  ;;  %v287_v9 = vld [vmem:[%s1254_s1 + $0x68] sm:$0xff] }
   0x3   :  { %v337_v4 = vld [vmem:[%s1254_s1 + $0x1f8] sm:$0xff]  ;;  %638 = vmatpush3.msra.mxu0 %v289_v1  ;;  %v336_v8 = vld [vmem:[%s1254_s1 + $0x1f0] sm:$0xff]  ;;  %v302_v11 = vld [vmem:[%s1254_s1 + $0xe0] sm:$0xff] }
   0x4   :  { %672 = vmatprep.subr.mxu1 %v337_v4  ;;  %v321_v7 = vld [vmem:[%s1254_s1 + $0x178] sm:$0xff]  ;;  %639 = vmatprep.subr.mxu0 %v304_v2  ;;  %v320_v10 = vld [vmem:[%s1254_s1 + $0x170] sm:$0xff]  ;;  %v335_v12 = vld [vmem:[%s1254_s1 + $0x1e8] sm:$0xff] }
   0x5   :  { %673 = vmatpush3.msra.mxu1 %v321_v7  ;;  %640 = vmatpush3.msra.mxu0 %v288_v3  ;;  %v319_v13 = vld [vmem:[%s1254_s1 + $0x168] sm:$0xff]  ;;  %v286_v14 = vld [vmem:[%s1254_s1 + $0x60] sm:$0xff]  ;;  %v301_v16 = vld [vmem:[%s1254_s1 + $0xd8] sm:$0xff]  ;;  %v196_v7 = vlaneseq }
   0x6   :  { %674 = vmatprep.subr.mxu1 %v336_v8  ;;  %641 = vmatprep.subr.mxu0 %v303_v6  ;;  %v334_v15 = vld [vmem:[%s1254_s1 + $0x1e0] sm:$0xff]  ;;  %v285_v18 = vld [vmem:[%s1254_s1 + $0x58] sm:$0xff]  ;;  %v300_v20 = vld [vmem:[%s1254_s1 + $0xd0] sm:$0xff] }
   0x7   :  { %675 = vmatpush3.msra.mxu1 %v320_v10  ;;  %642 = vmatpush3.msra.mxu0 %v287_v9  ;;  %v318_v17 = vld [vmem:[%s1254_s1 + $0x160] sm:$0xff]  ;;  %v333_v19 = vld [vmem:[%s1254_s1 + $0x1d8] sm:$0xff]  ;;  %v284_v22 = vld [vmem:[%s1254_s1 + $0x50] sm:$0xff] }
   0x8   :  { %676 = vmatprep.subr.mxu1 %v335_v12  ;;  %643 = vmatprep.subr.mxu0 %v302_v11  ;;  %v317_v21 = vld [vmem:[%s1254_s1 + $0x158] sm:$0xff]  ;;  %v332_v23 = vld [vmem:[%s1254_s1 + $0x1d0] sm:$0xff]  ;;  %v299_v24 = vld [vmem:[%s1254_s1 + $0xc8] sm:$0xff] }
   0x9   :  { %677 = vmatpush3.msra.mxu1 %v319_v13  ;;  %644 = vmatpush3.msra.mxu0 %v286_v14  ;;  %v316_v25 = vld [vmem:[%s1254_s1 + $0x150] sm:$0xff]  ;;  %v283_v26 = vld [vmem:[%s1254_s1 + $0x48] sm:$0xff]  ;;  %v298_v28 = vld [vmem:[%s1254_s1 + $0xc0] sm:$0xff] }
   0xa   :  { %678 = vmatprep.subr.mxu1 %v334_v15  ;;  %645 = vmatprep.subr.mxu0 %v301_v16  ;;  %v331_v27 = vld [vmem:[%s1254_s1 + $0x1c8] sm:$0xff]  ;;  %v282_v30 = vld [vmem:[%s1254_s1 + $0x40] sm:$0xff]  ;;  %v297_v32 = vld [vmem:[%s1254_s1 + $0xb8] sm:$0xff] }
   0xb   :  { %679 = vmatpush3.msra.mxu1 %v318_v17  ;;  %646 = vmatpush3.msra.mxu0 %v285_v18  ;;  %v315_v29 = vld [vmem:[%s1254_s1 + $0x148] sm:$0xff]  ;;  %v330_v31 = vld [vmem:[%s1254_s1 + $0x1c0] sm:$0xff]  ;;  %v281_v34 = vld [vmem:[%s1254_s1 + $0x38] sm:$0xff] }
   0xc   :  { %680 = vmatprep.subr.mxu1 %v333_v19  ;;  %647 = vmatprep.subr.mxu0 %v300_v20  ;;  %v314_v33 = vld [vmem:[%s1254_s1 + $0x140] sm:$0xff]  ;;  %v329_v35 = vld [vmem:[%s1254_s1 + $0x1b8] sm:$0xff]  ;;  %v296_v36 = vld [vmem:[%s1254_s1 + $0xb0] sm:$0xff] }
   0xd   :  { %681 = vmatpush3.msra.mxu1 %v317_v21  ;;  %648 = vmatpush3.msra.mxu0 %v284_v22  ;;  %v313_v37 = vld [vmem:[%s1254_s1 + $0x138] sm:$0xff]  ;;  %v280_v38 = vld [vmem:[%s1254_s1 + $0x30] sm:$0xff]  ;;  %v295_v39 = vld [vmem:[%s1254_s1 + $0xa8] sm:$0xff] }
   0xe   :  { %682 = vmatprep.subr.mxu1 %v332_v23  ;;  %649 = vmatprep.subr.mxu0 %v299_v24  ;;  %v328_v40 = vld [vmem:[%s1254_s1 + $0x1b0] sm:$0xff]  ;;  %v279_v41 = vld [vmem:[%s1254_s1 + $0x28] sm:$0xff]  ;;  %v294_v42 = vld [vmem:[%s1254_s1 + $0xa0] sm:$0xff] }
   0xf   :  { %683 = vmatpush3.msra.mxu1 %v316_v25  ;;  %650 = vmatpush3.msra.mxu0 %v283_v26  ;;  %v312_v43 = vld [vmem:[%s1254_s1 + $0x130] sm:$0xff]  ;;  %v278_v44 = vld [vmem:[%s1254_s1 + $0x20] sm:$0xff]  ;;  %v327_v45 = vld [vmem:[%s1254_s1 + $0x1a8] sm:$0xff] }
  0x10   :  { %684 = vmatprep.subr.mxu1 %v331_v27  ;;  %651 = vmatprep.subr.mxu0 %v298_v28  ;;  %v311_v46 = vld [vmem:[%s1254_s1 + $0x128] sm:$0xff]  ;;  %v326_v47 = vld [vmem:[%s1254_s1 + $0x1a0] sm:$0xff]  ;;  %v293_v48 = vld [vmem:[%s1254_s1 + $0x98] sm:$0xff]  ;;  %v768_v27 = vmov 1983009808  }
  0x11   :  { %685 = vmatpush3.msra.mxu1 %v315_v29  ;;  %652 = vmatpush3.msra.mxu0 %v282_v30  ;;  %v310_v49 = vld [vmem:[%s1254_s1 + $0x120] sm:$0xff]  ;;  %v24_v51 = vld [vmem:[%s1253_s0 + $0x8] sm:$0xff]  ;;  %v277_v52 = vld [vmem:[%s1254_s1 + $0x18] sm:$0xff]  ;;  %v1030_v28 = vunpack.c.l.s4 %v768_v27 }
  0x12   :  { %686 = vmatprep.subr.mxu1 %v330_v31  ;;  %653 = vmatprep.subr.mxu0 %v297_v32  ;;  %v23_v50 = vld [vmem:[%s1253_s0] sm:$0xff]  ;;  %v325_v53 = vld [vmem:[%s1254_s1 + $0x198] sm:$0xff]  ;;  %v25_v54 = vld [vmem:[%s1253_s0 + $0x10] sm:$0xff] }
  0x13   :  { %687 = vmatpush3.msra.mxu1 %v314_v33  ;;  %654 = vmatpush3.msra.mxu0 %v281_v34  ;;  %v26_v55 = vld [vmem:[%s1253_s0 + $0x18] sm:$0xff]  ;;  %v29_v56 = vld [vmem:[%s1253_s0 + $0x30] sm:$0xff]  ;;  %v31_v60 = vld [vmem:[%s1253_s0 + $0x40] sm:$0xff] }
  0x14   :  { %688 = vmatprep.subr.mxu1 %v329_v35  ;;  %655 = vmatprep.subr.mxu0 %v296_v36  ;;  %v292_v57 = vld [vmem:[%s1254_s1 + $0x90] sm:$0xff]  ;;  %v309_v58 = vld [vmem:[%s1254_s1 + $0x118] sm:$0xff]  ;;  %v32_v61 = vld [vmem:[%s1253_s0 + $0x48] sm:$0xff]  ;;  %v71_v62 = vadd.f32 %v29_v56, %v23_v50  ;;  %v89_v5 = vadd.f32 %v31_v60, %v25_v54  ;;  %v1044_v36 = vshrl.u32 %v196_v7, 7 }
  0x15   :  { %689 = vmatpush3.msra.mxu1 %v313_v37  ;;  %656 = vmatpush3.msra.mxu0 %v280_v38  ;;  %v30_v59 = vld [vmem:[%s1253_s0 + $0x38] sm:$0xff]  ;;  %v276_v63 = vld [vmem:[%s1254_s1 + $0x10] sm:$0xff]  ;;  %v35_v1 = vld [vmem:[%s1253_s0 + $0x60] sm:$0xff]  ;;  %v98_v6 = vadd.f32 %v32_v61, %v26_v55 }
  0x16   :  { %690 = vmatprep.subr.mxu1 %v328_v40  ;;  %657 = vmatprep.subr.mxu0 %v295_v39  ;;  %v324_v0 = vld [vmem:[%s1254_s1 + $0x190] sm:$0xff]  ;;  %v36_v2 = vld [vmem:[%s1253_s0 + $0x68] sm:$0xff]  ;;  %v80_v4 = vadd.f32 %v30_v59, %v24_v51  ;;  %v38_v10 = vld [vmem:[%s1253_s0 + $0x78] sm:$0xff]  ;;  %v72_v13 = vadd.f32 %v71_v62, %v35_v1 }
  0x17   :  { %691 = vmatpush3.msra.mxu1 %v312_v43  ;;  %658 = vmatpush3.msra.mxu0 %v279_v41  ;;  %v37_v3 = vld [vmem:[%s1253_s0 + $0x70] sm:$0xff]  ;;  %v291_v8 = vld [vmem:[%s1254_s1 + $0x88] sm:$0xff]  ;;  %v42_v12 = vld [vmem:[%s1253_s0 + $0x98] sm:$0xff]  ;;  %v99_v21 = vadd.f32 %v98_v6, %v38_v10 }
  0x18   :  { %692 = vmatprep.subr.mxu1 %v327_v45  ;;  %659 = vmatprep.subr.mxu0 %v294_v42  ;;  %v308_v9 = vld [vmem:[%s1254_s1 + $0x110] sm:$0xff]  ;;  %v275_v14 = vld [vmem:[%s1254_s1 + $0x8] sm:$0xff]  ;;  %v43_v16 = vld [vmem:[%s1253_s0 + $0xa0] sm:$0xff]  ;;  %v81_v19 = vadd.f32 %v80_v4, %v36_v2  ;;  %v90_v20 = vadd.f32 %v89_v5, %v37_v3 }
  0x19   :  { %693 = vmatpush3.msra.mxu1 %v311_v46  ;;  %660 = vmatpush3.msra.mxu0 %v278_v44  ;;  %v41_v11 = vld [vmem:[%s1253_s0 + $0x90] sm:$0xff]  ;;  %v323_v15 = vld [vmem:[%s1254_s1 + $0x188] sm:$0xff]  ;;  %v47_v18 = vld [vmem:[%s1253_s0 + $0xc0] sm:$0xff] }
  0x1a   :  { %694 = vmatprep.subr.mxu1 %v326_v47  ;;  %661 = vmatprep.subr.mxu0 %v293_v48  ;;  %v44_v17 = vld [vmem:[%s1253_s0 + $0xa8] sm:$0xff]  ;;  %v290_v22 = vld [vmem:[%s1254_s1 + $0x80] sm:$0xff]  ;;  %v49_v24 = vld [vmem:[%s1253_s0 + $0xd0] sm:$0xff]  ;;  %v73_v26 = vadd.f32 %v72_v13, %v41_v11  ;;  %v82_v33 = vadd.f32 %v81_v19, %v42_v12  ;;  %v91_v34 = vadd.f32 %v90_v20, %v43_v16 }
  0x1b   :  { %695 = vmatpush3.msra.mxu1 %v310_v49  ;;  %662 = vmatpush3.msra.mxu0 %v277_v52  ;;  %v48_v23 = vld [vmem:[%s1253_s0 + $0xc8] sm:$0xff]  ;;  %v50_v25 = vld [vmem:[%s1253_s0 + $0xd8] sm:$0xff]  ;;  %v274_v29 = vld [vmem:[%s1254_s1] sm:$0xff]  ;;  %v100_v35 = vadd.f32 %v99_v21, %v44_v17 }
  0x1c   :  { %696 = vmatprep.subr.mxu1 %v325_v53  ;;  %663 = vmatprep.subr.mxu0 %v292_v57  ;;  %v53_v30 = vld [vmem:[%s1253_s0 + $0xf0] sm:$0xff]  ;;  %v54_v31 = vld [vmem:[%s1253_s0 + $0xf8] sm:$0xff]  ;;  %v55_v32 = vld [vmem:[%s1253_s0 + $0x100] sm:$0xff]  ;;  %v74_v40 = vrot.slane %v73_v26, 4  ;;  %v83_v47 = vrot.slane %v82_v33, 4  ;;  %v92_v48 = vrot.slane %v91_v34, 4  ;;  %v195_v57 = vunpack.c.0.s8 %v1030_v28 }
  0x1d   :  { %697 = vmatpush3.msra.mxu1 %v309_v58  ;;  %664 = vmatpush3.msra.mxu0 %v276_v63  ;;  %v56_v37 = vld [vmem:[%s1253_s0 + $0x108] sm:$0xff]  ;;  %v59_v38 = vld [vmem:[%s1253_s0 + $0x120] sm:$0xff]  ;;  %v125_v41 = vadd.f32 %v53_v30, %v47_v18  ;;  %v134_v42 = vadd.f32 %v54_v31, %v48_v23  ;;  %v143_v43 = vadd.f32 %v55_v32, %v49_v24  ;;  %v61_v44 = vld [vmem:[%s1253_s0 + $0x130] sm:$0xff]  ;;  %v101_v49 = vrot.slane %v100_v35, 4 }
  0x1e   :  { %698 = vmatprep.subr.mxu1 %v324_v0  ;;  %v60_v39 = vld [vmem:[%s1253_s0 + $0x128] sm:$0xff]  ;;  %665 = vmatprep.subr.mxu0 %v291_v8  ;;  %v62_v45 = vld [vmem:[%s1253_s0 + $0x138] sm:$0xff]  ;;  %v65_v46 = vld [vmem:[%s1253_s0 + $0x150] sm:$0xff]  ;;  %v152_v50 = vadd.f32 %v56_v37, %v50_v25  ;;  %v75_v54 = vadd.f32 %v74_v40, %v73_v26  ;;  %v84_v58 = vadd.f32 %v83_v47, %v82_v33 }
  0x1f   :  { %699 = vmatpush3.msra.mxu1 %v308_v9  ;;  %666 = vmatpush3.msra.mxu0 %v275_v14  ;;  %v66_v51 = vld [vmem:[%s1253_s0 + $0x158] sm:$0xff]  ;;  %v67_v52 = vld [vmem:[%s1253_s0 + $0x160] sm:$0xff]  ;;  %v68_v53 = vld [vmem:[%s1253_s0 + $0x168] sm:$0xff]  ;;  %v126_v55 = vadd.f32 %v125_v41, %v59_v38  ;;  %v135_v56 = vadd.f32 %v134_v42, %v60_v39  ;;  %v93_v59 = vadd.f32 %v92_v48, %v91_v34 }
  0x20   :  { %700 = vmatprep.subr.mxu1 %v323_v15  ;;  %667 = vmatprep.subr.mxu0 %v290_v22  ;;  %v102_v60 = vadd.f32 %v101_v49, %v100_v35  ;;  %v144_v61 = vadd.f32 %v143_v43, %v61_v44  ;;  %v307_v62 = vld [vmem:[%s1254_s1 + $0x108] sm:$0xff]  ;;  %v369_v63 = vld [vmem:[%s1254_s1 + $0x2f8] sm:$0xff]  ;;  %v322_v0 = vld [vmem:[%s1254_s1 + $0x180] sm:$0xff]  ;;  %v76_v1 = vrot.slane %v75_v54, 2  ;;  %v153_v4 = vadd.f32 %v152_v50, %v62_v45 }
  0x21   :  { %668 = vmatpush3.msra.mxu0 %v274_v29  ;;  %v127_v2 = vadd.f32 %v126_v55, %v65_v46  ;;  %v136_v3 = vadd.f32 %v135_v56, %v66_v51  ;;  %701 = vmatpush3.msra.mxu1 %v307_v62  ;;  %v306_v5 = vld [vmem:[%s1254_s1 + $0x100] sm:$0xff]  ;;  %v85_v6 = vrot.slane %v84_v58, 2  ;;  %v94_v7 = vrot.slane %v93_v59, 2  ;;  %v28_v47 = vld [vmem:[%s1253_s0 + $0x28] sm:$0xff]  ;;  %v33_v48 = vld [vmem:[%s1253_s0 + $0x50] sm:$0xff] }
  0x22   :  { %v103_v8 = vrot.slane %v102_v60, 2  ;;  %v145_v9 = vadd.f32 %v144_v61, %v67_v52  ;;  %707 = vmatprep.subr.mxu0 %v369_v63  ;;  %702 = vmatprep.subr.mxu1 %v322_v0  ;;  %v77_v10 = vadd.f32 %v76_v1, %v75_v54  ;;  %v154_v13 = vadd.f32 %v153_v4, %v68_v53  ;;  %v27_v46 = vld [vmem:[%s1253_s0 + $0x20] sm:$0xff]  ;;  %v40_v53 = vld [vmem:[%s1253_s0 + $0x88] sm:$0xff]  ;;  %v45_v56 = vld [vmem:[%s1253_s0 + $0xb0] sm:$0xff] }
  0x23   :  { %v128_v11 = vrot.slane %v127_v2, 4  ;;  %v137_v12 = vrot.slane %v136_v3, 4  ;;  %703 = vmatpush3.msra.mxu1 %v306_v5  ;;  %v86_v14 = vadd.f32 %v85_v6, %v84_v58  ;;  %v95_v15 = vadd.f32 %v94_v7, %v93_v59  ;;  %v39_v52 = vld [vmem:[%s1253_s0 + $0x80] sm:$0xff]  ;;  %v52_v62 = vld [vmem:[%s1253_s0 + $0xe8] sm:$0xff]  ;;  %v57_v63 = vld [vmem:[%s1253_s0 + $0x110] sm:$0xff] }
  0x24   :  { %v104_v16 = vadd.f32 %v103_v8, %v102_v60  ;;  %v146_v17 = vrot.slane %v145_v9, 4  ;;  %v78_v18 = vrot.slane %v77_v10, 1  ;;  %v155_v21 = vrot.slane %v154_v13, 4  ;;  %v51_v58 = vld [vmem:[%s1253_s0 + $0xe0] sm:$0xff]  ;;  %v58_v0 = vld [vmem:[%s1253_s0 + $0x118] sm:$0xff]  ;;  %v64_v4 = vld [vmem:[%s1253_s0 + $0x148] sm:$0xff] }
  0x25   :  { %v129_v19 = vadd.f32 %v128_v11, %v127_v2  ;;  %v138_v20 = vadd.f32 %v137_v12, %v136_v3  ;;  %v87_v22 = vrot.slane %v86_v14, 1  ;;  %v96_v23 = vrot.slane %v95_v15, 1  ;;  %v63_v3 = vld [vmem:[%s1253_s0 + $0x140] sm:$0xff]  ;;  %v69_v11 = vld [vmem:[%s1253_s0 + $0x170] sm:$0xff]  ;;  %v70_v12 = vld [vmem:[%s1253_s0 + $0x178] sm:$0xff] }
  0x26   :  { %v105_v24 = vrot.slane %v104_v16, 1  ;;  %v147_v25 = vadd.f32 %v146_v17, %v145_v9  ;;  %v79_v26 = vadd.f32 %v78_v18, %v77_v10  ;;  %v156_v29 = vadd.f32 %v155_v21, %v154_v13 }
  0x27   :  { %v130_v27 = vrot.slane %v129_v19, 2  ;;  %v139_v28 = vrot.slane %v138_v20, 2  ;;  %v88_v30 = vadd.f32 %v87_v22, %v86_v14  ;;  %v97_v31 = vadd.f32 %v96_v23, %v95_v15 }
  0x28   :  { %v106_v32 = vadd.f32 %v105_v24, %v104_v16  ;;  %v148_v33 = vrot.slane %v147_v25, 2  ;;  %v157_v37 = vrot.slane %v156_v29, 2  ;;  %v1087_v45 = vsub.s32 %v195_v57, %v1044_v36  ;;  %v34_v36 = vld [vmem:[%s1253_s0 + $0x58] sm:$0xff] }
  0x29   :  { %v131_v34 = vadd.f32 %v130_v27, %v129_v19  ;;  %v140_v35 = vadd.f32 %v139_v28, %v138_v20  ;;  %v191_v43 = vcombine.low %v79_v26, %v88_v30  ;;  %v107_v54 = vadd.f32 %v33_v48, %v27_v46  ;;  %v46_v57 = vld [vmem:[%s1253_s0 + $0xb8] sm:$0xff] }
  0x2a   :  { %v149_v38 = vadd.f32 %v148_v33, %v147_v25  ;;  %v158_v41 = vadd.f32 %v157_v37, %v156_v29  ;;  %v192_v44 = vcombine.low %v97_v31, %v106_v32  ;;  %v116_v59 = vadd.f32 %v34_v36, %v28_v47 }
  0x2b   :  { %v132_v39 = vrot.slane %v131_v34, 1  ;;  %v141_v40 = vrot.slane %v140_v35, 1  ;;  %v108_v1 = vadd.f32 %v107_v54, %v39_v52  ;;  %v199_v2 = vrot.slane %v191_v43, %v1087_v45 }
  0x2c   :  { %v150_v42 = vrot.slane %v149_v38, 1  ;;  %v159_v51 = vrot.slane %v158_v41, 1  ;;  %v117_v5 = vadd.f32 %v116_v59, %v40_v53  ;;  %v161_v6 = vadd.f32 %v57_v63, %v51_v58 }
  0x2d   :  { %v133_v49 = vadd.f32 %v132_v39, %v131_v34  ;;  %v142_v50 = vadd.f32 %v141_v40, %v140_v35  ;;  %v170_v7 = vadd.f32 %v58_v0, %v52_v62  ;;  %v206_v8 = vrot.slane %v192_v44, %v1087_v45 }
  0x2e   :  { %v151_v55 = vadd.f32 %v150_v42, %v149_v38  ;;  %v160_v60 = vadd.f32 %v159_v51, %v158_v41  ;;  %v109_v13 = vadd.f32 %v108_v1, %v45_v56 }
  0x2f   :  { %v216_v61 = vcombine.low %v133_v49, %v142_v50 }
  0x30   :  { %v217_v9 = vcombine.low %v151_v55, %v160_v60 }
  0x31   :  { %v224_v10 = vrot.slane %v216_v61, %v1087_v45 }
  0x32   :  { %8 = vsyncpa [#allocation4], 0  ;;  %v118_v14 = vadd.f32 %v117_v5, %v46_v57  ;;  %v162_v15 = vadd.f32 %v161_v6, %v63_v3  ;;  %v171_v16 = vadd.f32 %v170_v7, %v64_v4  ;;  %v231_v17 = vrot.slane %v217_v9, %v1087_v45  ;;  %v353_v59 = vld [vmem:[%s1254_s1 + $0x278] sm:$0xff]  ;;  %v368_v63 = vld [vmem:[%s1254_s1 + $0x2f0] sm:$0xff]  ;;  %s769_s29 = smov [#allocation3]  }
  0x33   :  { %v110_v18 = vrot.slane %v109_v13, 4  ;;  %v207_v22 = vcombine.low %v199_v2, %v206_v8  ;;  %vm246_vm0 = vcmask 1041409   ;;  %vm248_vm1 = vcmask 1043459   ;;  %v352_v0 = vld [vmem:[%s1254_s1 + $0x270] sm:$0xff]  ;;  %v367_v2 = vld [vmem:[%s1254_s1 + $0x2e8] sm:$0xff]  ;;  %v366_v5 = vld [vmem:[%s1254_s1 + $0x2e0] sm:$0xff] }
  0x34   :  { %v119_v19 = vrot.slane %v118_v14, 4  ;;  %v163_v20 = vadd.f32 %v162_v15, %v69_v11  ;;  %v172_v21 = vadd.f32 %v171_v16, %v70_v12  ;;  %v232_v23 = vcombine.low %v224_v10, %v231_v17  ;;  %v351_v3 = vld [vmem:[%s1254_s1 + $0x268] sm:$0xff]  ;;  %v350_v8 = vld [vmem:[%s1254_s1 + $0x260] sm:$0xff]  ;;  %v365_v10 = vld [vmem:[%s1254_s1 + $0x2d8] sm:$0xff]  ;;  %s628_s30 = sshll.u32 %s769_s29, 4  ;;  %s629_s30 = int_to_ptr.vmem [resolvable:$true] %s628_s30 }
  0x35   :  { %v111_v24 = vadd.f32 %v110_v18, %v109_v13  ;;  %vm250_vm2 = vcmask 1045509   ;;  %vm252_vm3 = vcmask 1047559   ;;  %v22_v6 = vld [vmem:[#allocation2 + $0x8] sm:$0xf]  ;;  %v349_v12 = vld [vmem:[%s1254_s1 + $0x258] sm:$0xff]  ;;  %v348_v15 = vld [vmem:[%s1254_s1 + $0x250] sm:$0xff]  ;;  %p750_p1 = scmp.lt.s32.totalorder %s629_s30, %s629_s30 }
  0x36   :  { %v120_v25 = vadd.f32 %v119_v19, %v118_v14  ;;  %v164_v26 = vrot.slane %v163_v20, 4  ;;  %v173_v27 = vrot.slane %v172_v21, 4  ;;  %v245_v28 = vrot.slane %v232_v23, 7  ;;  %v364_v14 = vld [vmem:[%s1254_s1 + $0x2d0] sm:$0xff]  ;;  %v363_v16 = vld [vmem:[%s1254_s1 + $0x2c8] sm:$0xff]  ;;  %v362_v18 = vld [vmem:[%s1254_s1 + $0x2c0] sm:$0xff] }
  0x37   :  { %v112_v29 = vrot.slane %v111_v24, 2  ;;  %v347_v17 = vld [vmem:[%s1254_s1 + $0x248] sm:$0xff]  ;;  %v346_v19 = vld [vmem:[%s1254_s1 + $0x240] sm:$0xff]  ;;  %vm620_vm4 = vcmask 140288  }
  0x38   :  { %v121_v30 = vrot.slane %v120_v25, 2  ;;  %v165_v31 = vadd.f32 %v164_v26, %v163_v20  ;;  %v174_v32 = vadd.f32 %v173_v27, %v172_v21  ;;  %v247_v33 = vsel %vm246_vm0, %v245_v28, %v207_v22  ;;  %v361_v20 = vld [vmem:[%s1254_s1 + $0x2b8] sm:$0xff]  ;;  %v360_v22 = vld [vmem:[%s1254_s1 + $0x2b0] sm:$0xff]  ;;  %v359_v26 = vld [vmem:[%s1254_s1 + $0x2a8] sm:$0xff] }
  0x39   :  { %v113_v34 = vadd.f32 %v112_v29, %v111_v24  ;;  %v249_v35 = vsel %vm248_vm1, %v245_v28, %v247_v33  ;;  %v345_v21 = vld [vmem:[%s1254_s1 + $0x238] sm:$0xff]  ;;  %v344_v24 = vld [vmem:[%s1254_s1 + $0x230] sm:$0xff]  ;;  %v343_v27 = vld [vmem:[%s1254_s1 + $0x228] sm:$0xff] }
  0x3a   :  { %v122_v37 = vadd.f32 %v121_v30, %v120_v25  ;;  %v166_v38 = vrot.slane %v165_v31, 2  ;;  %v175_v39 = vrot.slane %v174_v32, 2  ;;  %v251_v40 = vsel %vm250_vm2, %v245_v28, %v249_v35  ;;  %v358_v29 = vld [vmem:[%s1254_s1 + $0x2a0] sm:$0xff]  ;;  %v356_v33 = vld [vmem:[%s1254_s1 + $0x290] sm:$0xff]  ;;  %v355_v35 = vld [vmem:[%s1254_s1 + $0x288] sm:$0xff] }
  0x3b   :  { %v114_v41 = vrot.slane %v113_v34, 1  ;;  %v253_v42 = vsel %vm252_vm3, %v245_v28, %v251_v40  ;;  %v342_v30 = vld [vmem:[%s1254_s1 + $0x220] sm:$0xff] }
  0x3c   :  { %v123_v43 = vrot.slane %v122_v37, 1  ;;  %v167_v44 = vadd.f32 %v166_v38, %v165_v31  ;;  %v176_v46 = vadd.f32 %v175_v39, %v174_v32  ;;  %v272_v51 = vmul.f32 0.03125, %v253_v42  ;;  %v357_v32 = vld [vmem:[%s1254_s1 + $0x298] sm:$0xff]  ;;  %v354_v38 = vld [vmem:[%s1254_s1 + $0x280] sm:$0xff] }
  0x3d   :  { %v115_v47 = vadd.f32 %v114_v41, %v113_v34  ;;  %v340_v34 = vld [vmem:[%s1254_s1 + $0x210] sm:$0xff]  ;;  %v338_v39 = vld [vmem:[%s1254_s1 + $0x200] sm:$0xff] }
  0x3e   :  { %v124_v48 = vadd.f32 %v123_v43, %v122_v37  ;;  %v168_v49 = vrot.slane %v167_v44, 1  ;;  %v177_v50 = vrot.slane %v176_v46, 1  ;;  %v386_v54 = vrot.slane %v272_v51, %v1087_v45  ;;  %v339_v37 = vld [vmem:[%s1254_s1 + $0x208] sm:$0xff] }
  0x3f   :  { %v379_v55 = vcombine.high %v272_v51, %v272_v51 }
  0x40   :  { %v169_v36 = vadd.f32 %v168_v49, %v167_v44  ;;  %v178_v52 = vadd.f32 %v177_v50, %v176_v46  ;;  %v208_v53 = vcombine.low %v115_v47, %v124_v48  ;;  %v394_v57 = vcombine.high %v386_v54, %v386_v54  ;;  %v636_v44 = vld [vmem:[%s1255_s2] ss:$0 sm:$0xff] }
  0x41   :  { %v393_v58 = vrot.slane %v379_v55, %v1087_v45 }
  0x42   :  { %v233_v56 = vcombine.low %v169_v36, %v178_v52  ;;  %v215_v60 = vrot.slane %v208_v53, %v1087_v45  ;;  %474 = vmatprep.mubr.f32.mxu0 %v394_v57 }
  0x43   :  { %v395_v62 = vcombine.high %v393_v58, %v393_v58  ;;  %475 = vmatmul.mubr.f32.vlgmr.msra.gmra.mxu0 %v386_v54 }
  0x44   :  { %v240_v61 = vrot.slane %v233_v56, %v1087_v45  ;;  %708 = vmatpush3.msra.mxu0 %v353_v59 }
  0x45   :  { %544 = vmatprep.mubr.f32.mxu1 %v395_v62  ;;  %709 = vmatprep.subr.mxu0 %v368_v63 }
  0x46   :  { %v256_v1 = vrot.slane %v240_v61, 7  ;;  %545 = vmatmul.mubr.f32.vlgmr.msra.gmra.mxu1 %v393_v58  ;;  %710 = vmatpush3.msra.mxu0 %v352_v0 }
  0x47   :  { %711 = vmatprep.subr.mxu0 %v367_v2 }
  0x48   :  { %v257_v4 = vsel %vm246_vm0, %v256_v1, %v215_v60  ;;  %712 = vmatpush3.msra.mxu0 %v351_v3 }
  0x49   :  { %v258_v7 = vsel %vm248_vm1, %v256_v1, %v257_v4  ;;  %713 = vmatprep.subr.mxu0 %v366_v5 }
  0x4a   :  { %v259_v9 = vsel %vm250_vm2, %v256_v1, %v258_v7  ;;  %714 = vmatpush3.msra.mxu0 %v350_v8 }
  0x4b   :  { %v260_v11 = vsel %vm252_vm3, %v256_v1, %v259_v9  ;;  %715 = vmatprep.subr.mxu0 %v365_v10 }
  0x4c   :  { %v264_v13 = vadd.f32 %v260_v11, %v22_v6  ;;  %716 = vmatpush3.msra.mxu0 %v349_v12 }
  0x4d   :  { %717 = vmatprep.subr.mxu0 %v364_v14 }
  0x4e   :  { %266 = vst [vmem:[#allocation2 + $0x8] sm:$0xf] %v264_v13  ;;  %718 = vmatpush3.msra.mxu0 %v348_v15 }
  0x4f   :  { %719 = vmatprep.subr.mxu0 %v363_v16 }
  0x50   :  { %720 = vmatpush3.msra.mxu0 %v347_v17 }
  0x51   :  { %721 = vmatprep.subr.mxu0 %v362_v18 }
  0x52   :  { %722 = vmatpush3.msra.mxu0 %v346_v19 }
  0x53   :  { %723 = vmatprep.subr.mxu0 %v361_v20 }
  0x54   :  { %724 = vmatpush3.msra.mxu0 %v345_v21 }
  0x55   :  { %v271_v23 = vld [vmem:[#allocation2 + $0x8] sm:$0xf]  ;;  %725 = vmatprep.subr.mxu0 %v360_v22 }
  0x56   :  { %v273_v25 = vmul.f32 0.03125, %v271_v23  ;;  %726 = vmatpush3.msra.mxu0 %v344_v24 }
  0x57   :  { %727 = vmatprep.subr.mxu0 %v359_v26 }
  0x58   :  { %v402_v28 = vrot.slane %v273_v25, %v1087_v45  ;;  %728 = vmatpush3.msra.mxu0 %v343_v27  ;;  %v341_v45 = vld [vmem:[%s1254_s1 + $0x218] sm:$0xff]  ;;  %s745_s1 = scalar_lea.vmem %s629_s30, 32 }
  0x59   :  { %729 = vmatprep.subr.mxu0 %v358_v29  ;;  %p746_p0 = scmp.ne.s32.totalorder %s629_s30, %s745_s1  ;;  %p751_p2 = scmp.lt.s32.totalorder %s745_s1, %s745_s1 }
  0x5a   :  { %v403_v31 = vcombine.high %v402_v28, %v402_v28  ;;  %730 = vmatpush3.msra.mxu0 %v342_v30 }
  0x5b   :  { %731 = vmatprep.subr.mxu0 %v357_v32  ;;  %p752_p3 = por %p751_p2, %p750_p1 }
  0x5c   :  { %614 = vmatprep.mubr.f32.mxu0 %v403_v31  ;;  %732 = vmatpush3.msra.mxu0 %v341_v45 }
  0x5d   :  { %733 = vmatprep.subr.mxu0 %v356_v33  ;;  %p753_p4 = pnand %p752_p3, %p746_p0 }
  0x5e   :  { %734 = vmatpush3.msra.mxu0 %v340_v34 }
  0x5f   :  { %735 = vmatprep.subr.mxu0 %v355_v35 }
  0x60   :  { %736 = vmatpush3.msra.mxu0 %v339_v37 }
  0x61   :  { %737 = vmatprep.subr.mxu0 %v354_v38 }
  0x62   :  { %738 = vmatpush3.msra.mxu0 %v338_v39 }
  0x63   :  { %615 = vmatmul.mubr.f32.vlgmr.msra.gmra.mxu0 %v402_v28 }
 0x103   :  { %v669_v40 = vpop.f32.mrf.mxu0 }
 0x105   :  { %v670_v41 = vpop.f32.mrf.mxu0 }
 0x106   :  { %v704_v42 = vpop.f32.mrf.mxu1  ;;  %v671_v43 = vadd.f32 %v670_v41, %v669_v40 }
 0x108   :  { %v705_v46 = vpop.f32.mrf.mxu1  ;;  %v477_v47 = vadd.f32 %v671_v43, %v636_v44 }
 0x109   :  { %v706_v48 = vadd.f32 %v705_v46, %v704_v42 }
 0x10b   :  { %v547_v51 = vadd.f32 %v706_v48, %v477_v47 }
 0x123   :  { %v739_v49 = vpop.f32.mrf.mxu0 }
 0x125   :  { %v740_v50 = vpop.f32.mrf.mxu0 }
 0x126   :  { %v741_v36 = vadd.f32 %v740_v50, %v739_v49 }
 0x128   :  { %v617_v52 = vadd.f32 %v741_v36, %v547_v51 }
 0x12a   :  { %621 = vst.msk [vmem:[#allocation3] sm:$0x3] %vm620_vm4, %v617_v52 }
 0x12b   :  { %756 = shalt.err (!%p753_p4)
}
 0x12c   :  { %631 = dma.vmem_to_hbm [thread:$0]  %s629_s30, 32, %s1256_s3, [#allocation4]  }
 0x12d   :  { %765 = dma.done.wait [#allocation4], 32  }
 0x12e   :  { %766 = vsyncadd [#allocation4], 4294967264 }
 0x12f   :  { %635 = vsyncpa [#allocation4], 1 }

</bundles_post_ra>
